<compile_context>
chip_gen: v7x
topology: tpu7x:2x2x1
jax: 0.10.0
libtpu: 0.0.40
codegen_flags: <defaults>
</compile_context>

<pallas_src>
import jax
import jax.numpy as jnp
from jax import lax
from jax.experimental import pallas as pl
from jax.experimental.pallas import tpu as pltpu

INT_SHIFT = 3  # shift_convolve pads with 2 on each side => int_shift == 3


def _ntm_attention_kernel(scal_ref, key_ref, w_prev_ref, memory_ref, out_ref):
    i = pl.program_id(0)
    TB, _, N = w_prev_ref.shape            # (TB, 1, N)
    M = memory_ref.shape[2]                # (1, TB*N, M)

    # Single read of the whole (TB*N, M) memory slab for this grid step.
    mem = memory_ref[0].astype(jnp.float32)                    # (TB*N, M)
    keys = key_ref[0].astype(jnp.float32) + 1e-12              # (TB, M)

    cdims = (((1,), (1,)), ((), ()))       # contract the trailing M axes
    # Two MXU launches per grid step (instead of 2*TB), DEFAULT precision:
    #   dot_all[t, t*N + n] = key_t . memory[t, n, :]   (off-diagonal blocks unused)
    #   sq_all[0, t*N + n]  = || memory[t, n, :] ||^2
    dot_all = lax.dot_general(keys, mem, cdims,
                              preferred_element_type=jnp.float32)            # (TB, TB*N)
    sq_all = lax.dot_general(jnp.ones((1, M), jnp.float32), mem * mem, cdims,
                             preferred_element_type=jnp.float32)             # (1, TB*N)
    key_sq = jnp.sum(keys * keys, axis=-1, keepdims=True)                    # (TB, 1)

    for t in range(TB):                    # static unroll over the batch tile
        base = 6 * (i * TB + t)            # packed scalars live flat in SMEM
        beta = scal_ref[base + 0]
        g = scal_ref[base + 1]
        gamma = scal_ref[base + 2]
        s0 = scal_ref[base + 3]
        s1 = scal_ref[base + 4]
        s2 = scal_ref[base + 5]

        dot = dot_all[t:t + 1, t * N:(t + 1) * N]              # (1, N), lane-dense
        mem_sq = sq_all[0:1, t * N:(t + 1) * N]                # (1, N)

        # cos = dot / max(||mem||*||key||, 1e-8) == dot * rsqrt(max(prod^2, 1e-16))
        inv_norm = lax.rsqrt(jnp.maximum(mem_sq * key_sq[t:t + 1, :], 1e-16))  # EUP
        cos = dot * inv_norm

        # content weighting: softmax(beta * cos) over N (approx reciprocal -> EUP)
        logits = beta * cos
        e = jnp.exp(logits - jnp.max(logits, axis=-1, keepdims=True))
        w_c = e * pl.reciprocal(jnp.sum(e, axis=-1, keepdims=True), approx=True)

        # interpolate with the previous weighting
        w_g = g * w_c + (1.0 - g) * w_prev_ref[t].astype(jnp.float32)

        # circular 3-tap shift: w_hat[i] = s0*w_g[i-1] + s1*w_g[i] + s2*w_g[i+1]
        # (static-shift rolls lower to XLU lane rotations, off the VPU slots)
        w_hat = (s0 * jnp.roll(w_g, 1, axis=-1)
                 + s1 * w_g
                 + s2 * jnp.roll(w_g, -1, axis=-1))

        # sharpen: w_hat ** gamma = exp(gamma*log(.)) with a tiny positive floor so an
        # underflowed tap cannot become NaN; EXACT final normalisation (sum-to-1).
        w_pow = jnp.exp(gamma * jnp.log(jnp.maximum(w_hat, 1e-30)))
        denom = jnp.sum(w_pow, axis=-1, keepdims=True) + 1e-12
        out_ref[t] = (w_pow / denom).astype(out_ref.dtype)


def _pick_batch_tile(B, N, M, max_block_bytes=8 << 20):
    """Largest TB that (a) divides B, (b) keeps >= 2 grid steps when B >= 2 so both
    v7x TensorCores get work, and (c) keeps the double-buffered memory block well
    inside scoped VMEM (lane padding counted: M pads to 128)."""
    per_b_bytes = N * max(M, 128) * 4
    cap = int(max(1, min(8, max_block_bytes // (2 * per_b_bytes))))
    best = 1
    for tb in range(1, min(B, cap) + 1):
        if B % tb == 0 and (B // tb >= 2 or B == 1):
            best = tb
    return best


def ntm_attention(params, w_prev, memory, int_shift=INT_SHIFT):
    """Pallas wrapper: grid over B//TB, TB batch elements per step."""
    beta, kappa = params['beta'], params['kappa']
    gamma, g, s = params['gamma'], params['g'], params['s']
    B, N, M = memory.shape
    assert int_shift == 3 and s.shape == (B, int_shift)
    assert kappa.shape == (B, M) and w_prev.shape == (B, N)

    TB = _pick_batch_tile(B, N, M)
    steps = B // TB

    # Per-batch head scalars packed FLAT (1-D) for the SMEM scalar-prefetch buffer:
    # [beta, g, gamma, s0, s1, s2] per batch element -> shape (6*B,).
    scalars = jnp.concatenate(
        [beta.reshape(B, 1), g.reshape(B, 1), gamma.reshape(B, 1), s.reshape(B, 3)],
        axis=-1).astype(jnp.float32).reshape(B * 6)

    # Free (contiguous) reshapes so each block's trailing two dims equal the full array
    # dims (TPU (8,128) tiling rule) and each grid step covers TB batch elements.
    kappa_r = kappa.astype(jnp.float32).reshape(steps, TB, M)
    w_prev_r = w_prev.astype(jnp.float32).reshape(B, 1, N)
    memory_r = memory.reshape(steps, TB * N, M)
    # NOTE: storing memory as (B, M, N) upstream would make the big tile lane-dense
    # (N on lanes); a per-call transpose here would cost a full HBM pass, so skipped.

    grid_spec = pltpu.PrefetchScalarGridSpec(
        num_scalar_prefetch=1,
        grid=(steps,),
        in_specs=[
            pl.BlockSpec((1, TB, M), lambda i, scal: (i, 0, 0)),      # keys
            pl.BlockSpec((TB, 1, N), lambda i, scal: (i, 0, 0)),      # w_prev
            pl.BlockSpec((1, TB * N, M), lambda i, scal: (i, 0, 0)),  # memory (big)
        ],
        out_specs=pl.BlockSpec((TB, 1, N), lambda i, scal: (i, 0, 0)),
    )

    out = pl.pallas_call(
        _ntm_attention_kernel,
        out_shape=jax.ShapeDtypeStruct((B, 1, N), jnp.float32),
        grid_spec=grid_spec,
        compiler_params=pltpu.CompilerParams(
            dimension_semantics=("parallel",),       # >=2 steps -> both v7x TCs busy
            vmem_limit_bytes=32 * 1024 * 1024),      # explicit budget (v7x: 64 MiB phys)
    )(scalars, kappa_r, w_prev_r, memory_r)
    return out.reshape(B, N)


def ntm_attention_ref(params, w_prev, memory):
    """Pure-JAX reference mirroring the PyTorch forward."""
    beta, kappa = params['beta'], params['kappa']
    gamma, g, s = params['gamma'], params['g'], params['s']
    mem = memory + 1e-12
    key = kappa[:, None, :] + 1e-12
    dot = jnp.sum(mem * key, axis=-1)
    cos = dot / jnp.maximum(jnp.linalg.norm(mem, axis=-1)
                            * jnp.linalg.norm(key, axis=-1), 1e-8)
    w_c = jax.nn.softmax(beta * cos, axis=-1)
    w_g = g * w_c + (1.0 - g) * w_prev
    w_hat = (s[:, 0:1] * jnp.roll(w_g, 1, axis=-1)
             + s[:, 1:2] * w_g
             + s[:, 2:3] * jnp.roll(w_g, -1, axis=-1))
    w = w_hat ** gamma
    return w / (jnp.sum(w, axis=-1, keepdims=True) + 1e-12)


if __name__ == "__main__":
    def run_case(B, N, M, seed):
        key0 = jax.random.PRNGKey(seed)
        k1, k2, k3, k4, k5, k6, k7 = jax.random.split(key0, 7)

        memory = jax.random.normal(k1, (B, N, M), dtype=jnp.float32)
        kappa = jax.random.normal(k2, (B, M), dtype=jnp.float32)
        # Head outputs use their usual NTM activations so the forward is well-defined.
        beta = jax.nn.softplus(jax.random.normal(k3, (B, 1), dtype=jnp.float32))
        g = jax.nn.sigmoid(jax.random.normal(k4, (B, 1), dtype=jnp.float32))
        gamma = 1.0 + jax.nn.softplus(jax.random.normal(k5, (B, 1), dtype=jnp.float32))
        s = jax.nn.softmax(jax.random.normal(k6, (B, INT_SHIFT), dtype=jnp.float32),
                           axis=-1)
        w_prev = jax.nn.softmax(jax.random.normal(k7, (B, N), dtype=jnp.float32),
                                axis=-1)
        params = {'beta': beta, 'kappa': kappa, 'gamma': gamma, 'g': g, 's': s}

        out = jax.block_until_ready(ntm_attention(params, w_prev, memory, INT_SHIFT))
        ref = ntm_attention_ref(params, w_prev, memory)
        assert out.shape == (B, N)
        # Exact final normalisation -> rows sum to 1 at f32 accuracy.
        assert jnp.allclose(jnp.sum(out, axis=-1), 1.0, atol=1e-4)
        # Tolerance covers the DEFAULT-precision (bf16-input) MXU contractions and the
        # EUP approx reciprocal in the softmax, both requested by the perf review.
        assert jnp.allclose(out, ref, atol=5e-3, rtol=5e-3), \
            float(jnp.max(jnp.abs(out - ref)))

    run_case(B=2, N=128, M=32, seed=0)   # TB=1, grid=(2,)  -> 2 parallel steps
    run_case(B=8, N=128, M=32, seed=1)   # TB=4, grid=(2,)  -> batched path exercised
    print("KERNEL_OK")
</pallas_src>

<mosaic_0001>
module attributes {stable_mosaic.version = 11 : i64} {
  func.func @_ntm_attention_kernel(%arg0: i32, %arg1: memref<12xf32, #tpu.memory_space<smem>>, %arg2: memref<1x1x32xf32, #tpu.memory_space<vmem>>, %arg3: memref<1x1x128xf32, #tpu.memory_space<vmem>>, %arg4: memref<1x128x32xf32, #tpu.memory_space<vmem>>, %arg5: memref<1x1x128xf32, #tpu.memory_space<vmem>>) attributes {dimension_semantics = [#tpu.dimension_semantics<parallel>], iteration_bounds = array<i64: 2>, scalar_prefetch = 1 : i64, scratch_operands = 0 : i64, tpu.core_type = #tpu.core_type<tc>, window_params = [{transform_indices = @transform_0, window_bounds = array<i64: 1, 1, 32>}, {transform_indices = @transform_1, window_bounds = array<i64: 1, 1, 128>}, {transform_indices = @transform_2, window_bounds = array<i64: 1, 128, 32>}, {transform_indices = @transform_3, window_bounds = array<i64: 1, 1, 128>}]} {
    %c0 = arith.constant 0 : index
    %c0_0 = arith.constant 0 : index
    %c0_1 = arith.constant 0 : index
    %0 = vector.load %arg4[%c0, %c0_0, %c0_1] : memref<1x128x32xf32, #tpu.memory_space<vmem>>, vector<1x128x32xf32>
    %1 = vector.shape_cast %0 : vector<1x128x32xf32> to vector<128x32xf32>
    %c0_2 = arith.constant 0 : index
    %c0_3 = arith.constant 0 : index
    %c0_4 = arith.constant 0 : index
    %2 = vector.load %arg2[%c0_2, %c0_3, %c0_4] : memref<1x1x32xf32, #tpu.memory_space<vmem>>, vector<1x1x32xf32>
    %3 = vector.shape_cast %2 : vector<1x1x32xf32> to vector<1x32xf32>
    %cst = arith.constant 9.99999996E-13 : f32
    %4 = vector.broadcast %cst : f32 to vector<1x32xf32>
    %5 = arith.addf %3, %4 : vector<1x32xf32>
    %cst_5 = arith.constant dense<0.000000e+00> : vector<1x128xf32>
    %6 = tpu.matmul %5, %1, %cst_5 {dimension_numbers = #tpu.dot_dimension_numbers<[1], [1], [0], [0], [0, 0, 1, 0], [], []>} : vector<1x32xf32>, vector<128x32xf32>, vector<1x128xf32> -> vector<1x128xf32>
    %cst_6 = arith.constant 1.000000e+00 : f32
    %7 = vector.broadcast %cst_6 : f32 to vector<1x32xf32>
    %8 = arith.mulf %1, %1 : vector<128x32xf32>
    %cst_7 = arith.constant dense<0.000000e+00> : vector<1x128xf32>
    %9 = tpu.matmul %7, %8, %cst_7 {dimension_numbers = #tpu.dot_dimension_numbers<[1], [1], [0], [0], [0, 0, 1, 0], [], []>} : vector<1x32xf32>, vector<128x32xf32>, vector<1x128xf32> -> vector<1x128xf32>
    %10 = arith.mulf %5, %5 : vector<1x32xf32>
    %cst_8 = arith.constant dense<0.000000e+00> : vector<1xf32>
    %11 = vector.multi_reduction <add>, %10, %cst_8 [1] : vector<1x32xf32> to vector<1xf32>
    %12 = vector.shape_cast %11 : vector<1xf32> to vector<1x1xf32>
    %c1_i32 = arith.constant 1 : i32
    %13 = arith.muli %arg0, %c1_i32 : i32
    %c0_i32 = arith.constant 0 : i32
    %14 = arith.addi %13, %c0_i32 : i32
    %c6_i32 = arith.constant 6 : i32
    %15 = arith.muli %c6_i32, %14 : i32
    %c0_i32_9 = arith.constant 0 : i32
    %16 = arith.addi %15, %c0_i32_9 : i32
    %17 = arith.index_cast %16 : i32 to index
    %18 = memref.load %arg1[%17] : memref<12xf32, #tpu.memory_space<smem>>
    %c1_i32_10 = arith.constant 1 : i32
    %19 = arith.addi %15, %c1_i32_10 : i32
    %20 = arith.index_cast %19 : i32 to index
    %21 = memref.load %arg1[%20] : memref<12xf32, #tpu.memory_space<smem>>
    %c2_i32 = arith.constant 2 : i32
    %22 = arith.addi %15, %c2_i32 : i32
    %23 = arith.index_cast %22 : i32 to index
    %24 = memref.load %arg1[%23] : memref<12xf32, #tpu.memory_space<smem>>
    %c3_i32 = arith.constant 3 : i32
    %25 = arith.addi %15, %c3_i32 : i32
    %26 = arith.index_cast %25 : i32 to index
    %27 = memref.load %arg1[%26] : memref<12xf32, #tpu.memory_space<smem>>
    %c4_i32 = arith.constant 4 : i32
    %28 = arith.addi %15, %c4_i32 : i32
    %29 = arith.index_cast %28 : i32 to index
    %30 = memref.load %arg1[%29] : memref<12xf32, #tpu.memory_space<smem>>
    %c5_i32 = arith.constant 5 : i32
    %31 = arith.addi %15, %c5_i32 : i32
    %32 = arith.index_cast %31 : i32 to index
    %33 = memref.load %arg1[%32] : memref<12xf32, #tpu.memory_space<smem>>
    %34 = vector.broadcast %12 : vector<1x1xf32> to vector<1x128xf32>
    %35 = arith.mulf %9, %34 : vector<1x128xf32>
    %cst_11 = arith.constant 1.000000e-16 : f32
    %36 = vector.broadcast %cst_11 : f32 to vector<1x128xf32>
    %37 = arith.maximumf %35, %36 : vector<1x128xf32>
    %38 = math.rsqrt %37 : vector<1x128xf32>
    %39 = arith.mulf %6, %38 : vector<1x128xf32>
    %40 = vector.broadcast %18 : f32 to vector<1x128xf32>
    %41 = arith.mulf %40, %39 : vector<1x128xf32>
    %cst_12 = arith.constant dense<0xFF800000> : vector<1xf32>
    %42 = vector.multi_reduction <maximumf>, %41, %cst_12 [1] : vector<1x128xf32> to vector<1xf32>
    %43 = vector.shape_cast %42 : vector<1xf32> to vector<1x1xf32>
    %44 = vector.broadcast %43 : vector<1x1xf32> to vector<1x128xf32>
    %45 = arith.subf %41, %44 : vector<1x128xf32>
    %46 = math.exp %45 : vector<1x128xf32>
    %cst_13 = arith.constant dense<0.000000e+00> : vector<1xf32>
    %47 = vector.multi_reduction <add>, %46, %cst_13 [1] : vector<1x128xf32> to vector<1xf32>
    %48 = vector.shape_cast %47 : vector<1xf32> to vector<1x1xf32>
    %49 = tpu.reciprocal %48 {approx = true} : vector<1x1xf32> -> vector<1x1xf32>
    %50 = vector.broadcast %49 : vector<1x1xf32> to vector<1x128xf32>
    %51 = arith.mulf %46, %50 : vector<1x128xf32>
    %52 = vector.broadcast %21 : f32 to vector<1x128xf32>
    %53 = arith.mulf %52, %51 : vector<1x128xf32>
    %cst_14 = arith.constant 1.000000e+00 : f32
    %54 = arith.subf %cst_14, %21 : f32
    %c0_15 = arith.constant 0 : index
    %c0_16 = arith.constant 0 : index
    %c0_17 = arith.constant 0 : index
    %55 = vector.load %arg3[%c0_15, %c0_16, %c0_17] : memref<1x1x128xf32, #tpu.memory_space<vmem>>, vector<1x1x128xf32>
    %56 = vector.shape_cast %55 : vector<1x1x128xf32> to vector<1x128xf32>
    %57 = vector.broadcast %54 : f32 to vector<1x128xf32>
    %58 = arith.mulf %57, %56 : vector<1x128xf32>
    %59 = arith.addf %53, %58 : vector<1x128xf32>
    %60 = vector.extract_strided_slice %59 {offsets = [0, 127], sizes = [1, 1], strides = [1, 1]} : vector<1x128xf32> to vector<1x1xf32>
    %61 = vector.extract_strided_slice %59 {offsets = [0, 0], sizes = [1, 127], strides = [1, 1]} : vector<1x128xf32> to vector<1x127xf32>
    %62 = tpu.concatenate %60, %61 in 1 : vector<1x1xf32>, vector<1x127xf32> -> vector<1x128xf32>
    %63 = vector.broadcast %27 : f32 to vector<1x128xf32>
    %64 = arith.mulf %63, %62 : vector<1x128xf32>
    %65 = vector.broadcast %30 : f32 to vector<1x128xf32>
    %66 = arith.mulf %65, %59 : vector<1x128xf32>
    %67 = arith.addf %64, %66 : vector<1x128xf32>
    %68 = vector.extract_strided_slice %59 {offsets = [0, 1], sizes = [1, 127], strides = [1, 1]} : vector<1x128xf32> to vector<1x127xf32>
    %69 = vector.extract_strided_slice %59 {offsets = [0, 0], sizes = [1, 1], strides = [1, 1]} : vector<1x128xf32> to vector<1x1xf32>
    %70 = tpu.concatenate %68, %69 in 1 : vector<1x127xf32>, vector<1x1xf32> -> vector<1x128xf32>
    %71 = vector.broadcast %33 : f32 to vector<1x128xf32>
    %72 = arith.mulf %71, %70 : vector<1x128xf32>
    %73 = arith.addf %67, %72 : vector<1x128xf32>
    %cst_18 = arith.constant 1.000000e-30 : f32
    %74 = vector.broadcast %cst_18 : f32 to vector<1x128xf32>
    %75 = arith.maximumf %73, %74 : vector<1x128xf32>
    %76 = math.log %75 : vector<1x128xf32>
    %77 = vector.broadcast %24 : f32 to vector<1x128xf32>
    %78 = arith.mulf %77, %76 : vector<1x128xf32>
    %79 = math.exp %78 : vector<1x128xf32>
    %cst_19 = arith.constant dense<0.000000e+00> : vector<1xf32>
    %80 = vector.multi_reduction <add>, %79, %cst_19 [1] : vector<1x128xf32> to vector<1xf32>
    %81 = vector.shape_cast %80 : vector<1xf32> to vector<1x1xf32>
    %cst_20 = arith.constant 9.99999996E-13 : f32
    %82 = vector.broadcast %cst_20 : f32 to vector<1x1xf32>
    %83 = arith.addf %81, %82 : vector<1x1xf32>
    %84 = vector.broadcast %83 : vector<1x1xf32> to vector<1x128xf32>
    %85 = arith.divf %79, %84 : vector<1x128xf32>
    %c0_21 = arith.constant 0 : index
    %c0_22 = arith.constant 0 : index
    %c0_23 = arith.constant 0 : index
    %86 = vector.load %arg5[%c0_21, %c0_22, %c0_23] : memref<1x1x128xf32, #tpu.memory_space<vmem>>, vector<1x1x128xf32>
    %87 = vector.shape_cast %86 : vector<1x1x128xf32> to vector<1x128xf32>
    %88 = vector.shape_cast %85 : vector<1x128xf32> to vector<1x1x128xf32>
    tpu.vector_store %arg5[%c0_21, %c0_22, %c0_23], %88 {strides = array<i32>} : memref<1x1x128xf32, #tpu.memory_space<vmem>>, vector<1x1x128xf32>,
    return
  }
  func.func @transform_0(%arg0: i32, %arg1: memref<12xf32, #tpu.memory_space<smem>>) -> (i32, i32, i32) {
    %c0_i32 = arith.constant 0 : i32
    %c0_i32_0 = arith.constant 0 : i32
    %c0_i32_1 = arith.constant 0 : i32
    return %arg0, %c0_i32, %c0_i32_0 : i32, i32, i32
  }
  func.func @transform_1(%arg0: i32, %arg1: memref<12xf32, #tpu.memory_space<smem>>) -> (i32, i32, i32) {
    %c0_i32 = arith.constant 0 : i32
    %c0_i32_0 = arith.constant 0 : i32
    %c0_i32_1 = arith.constant 0 : i32
    return %arg0, %c0_i32, %c0_i32_0 : i32, i32, i32
  }
  func.func @transform_2(%arg0: i32, %arg1: memref<12xf32, #tpu.memory_space<smem>>) -> (i32, i32, i32) {
    %c0_i32 = arith.constant 0 : i32
    %c0_i32_0 = arith.constant 0 : i32
    %c0_i32_1 = arith.constant 0 : i32
    return %arg0, %c0_i32, %c0_i32_0 : i32, i32, i32
  }
  func.func @transform_3(%arg0: i32, %arg1: memref<12xf32, #tpu.memory_space<smem>>) -> (i32, i32, i32) {
    %c0_i32 = arith.constant 0 : i32
    %c0_i32_0 = arith.constant 0 : i32
    %c0_i32_1 = arith.constant 0 : i32
    return %arg0, %c0_i32, %c0_i32_0 : i32, i32, i32
  }
}

</mosaic_0001>

<bundles_post_ra>
// kernel: tpu_custom_call.1
= control target key start
LH: loop header
LB: loop body
LE: loop exit
PB: predicated region body
PF: predicated region fallthrough
CT: control target
= control target key end

     0   :  { %s1223_s0 = inlined_call_operand.vmem [shape: f32[12], index: 0, kind: input, shape index: {}]   ;;  %s1224_s1 = inlined_call_operand.vmem [shape: f32[2,1,32], index: 1, kind: input, shape index: {}]   ;;  %s1225_s2 = inlined_call_operand.vmem [shape: f32[2,1,128], index: 2, kind: input, shape index: {}]   ;;  %s1226_s3 = inlined_call_operand.vmem [shape: f32[2,128,32], index: 3, kind: input, shape index: {}]   ;;  %s1227_s4 = inlined_call_operand.hbm [shape: f32[2,1,128], index: 4, kind: output, shape index: {}]  }
   0x1   :  { %s9_s17 = sshll.u32 %s1223_s0, 4  ;;  %s10_s17 = int_to_ptr.vmem [resolvable:$true] %s9_s17 }
   0x2   :  { %s907_s18 = scalar_lea.vmem %s10_s17, 16  ;;  %p912_p1 = scmp.lt.s32.totalorder %s10_s17, %s10_s17 }
   0x3   :  { %p908_p0 = scmp.ne.s32.totalorder %s10_s17, %s907_s18  ;;  %p913_p2 = scmp.lt.s32.totalorder %s907_s18, %s907_s18 }
   0x5   :  { %p914_p3 = por %p913_p2, %p912_p1 }
   0x7   :  { %p915_p4 = pnand %p914_p3, %p908_p0 }
   0x9   :  { %918 = shalt.err (!%p915_p4)  }
   0xa   :  { %s985_s19 = smov [#allocation3]  }
   0xb   :  { %12 = dma.vmem_to_smem %s10_s17, 16, %s985_s19, [#allocation2] }
   0xc   :  { %963 = dma.done.wait [#allocation2], 16 }
   0xd   :  { %964 = vsyncadd [#allocation2], 4294967280 }
   0xe   :  { %14 = sfence }
   0xf   :  { %15 = vsyncpa [#allocation5], 0 }
  0x10   :  { %17 = vsyncpa [#allocation5 + $0x1], 0  ;;  %s1021_s20 = smov 0   ;;  %s1023_s21 = smov 0  }
  0x11   :  { %s1025_s0 = smov 0   ;;  %s1027_s22 = smov 0  }
  0x12 LB: > { %s1042_s23 = sadd.s32 4294967295, %s983_s22   ;;  %s637_s24 = sadd.s32 4294967294, %s983_s22   ;;  %s983_s22 = sphi %s1027_s22, %s1235_s22   ;;  %s979_s0 = sphi %s1025_s0, %s1234_s0   ;;  %s975_s21 = sphi %s1023_s21, %s1233_s21   ;;  %s971_s20 = sphi %s1021_s20, %s1232_s20  }
  0x13   : > { %s1046_s25 = sadd.s32 1, %s983_s22   ;;  %s108_s26 = sadd.s32 1, %s979_s0 }
  0x14   : > { %s105_s27 = ssub.s32 %s983_s22, %s1046_s25  ;;  %p118_p5 = scmp.ne.s32.totalorder %s979_s0, %s975_s21 }
  0x15   : > { %p106_p6 = scmp.eq.s32.totalorder %s105_s27, 0  ;;  %p119_p7 = scmp.eq.s32.totalorder %s1042_s23, 1 }
  0x16   : > { %p124_p8 = scmp.ne.s32.totalorder %s975_s21, %s971_s20  ;;  %p125_p9 = scmp.eq.s32.totalorder %s637_s24, 1 }
  0x17   : > { %s1057_s28 = scalar_select %p106_p6, %s979_s0, %s108_s26  }
  0x18   : > { %p1059_p10 = por %p119_p7, %p118_p5  ;;  %p1063_p11 = por %p125_p9, %p124_p8 }
  0x19   : > { %p640_p12 = scmp.ge.s32.totalorder %s983_s22, 1  ;;  %p163_p13 = scmp.lt.s32.totalorder %s983_s22, 3 }
  0x1b   : > { %p164_p0 = pnand %p640_p12, %p163_p13 }
  0x1c   : > { %p192_p1 = scmp.lt.s32.totalorder (!%p164_p0), %s1042_s23, 1  ;;  %v986_v0 = vmov (!%p164_p0), 0.0|0.0   ;;  %vm987_vm0 = vmmov (!%p164_p0), 0   ;;  %v988_v1 = vmov (!%p164_p0), 0.0   ;;  %vm221_vm1 = vcmask (!%p164_p0), 261120   ;;  %s1161_s13 = smul.u32 (!%p164_p0), 6, %s1042_s23 }
  0x1d   : > { %167 = sbr.rel (%p164_p0) target bundleno = 980 (0x3d4), region = 32  ;;  %817 = vmatprep.subr.bf16.mxu1 (!%p164_p0), %v986_v0  ;;  %785 = vmatprep.subr.bf16.mxu0 (!%p164_p0), %v986_v0  ;;  %vm1089_vm2 = vmpackc.low (!%p164_p0), %vm221_vm1, %vm221_vm1  ;;  %vm481_vm3 = vcmask (!%p164_p0), 253952   ;;  %v989_v55 = vmov (!%p164_p0), 1.0   ;;  %vm503_vm4 = vcmask (!%p164_p0), 1040384   ;;  %s990_s26 = smov (!%p164_p0), 127  }
  0x1e   : > { %782 = vmatprep.mubr.msk.f32.mxu1 (!%p164_p0), %vm987_vm0, %v988_v1  ;;  %747 = vmatprep.mubr.msk.f32.mxu0 (!%p164_p0), %vm987_vm0, %v988_v1  ;;  %s486_s14 = sld [smem:[#allocation3 + %s1161_s13]] (!%p164_p0)  ;;  %s487_s15 = sadd.s32 (!%p164_p0), 1, %s1161_s13 }
  0x1f   : > { %s488_s16 = sld [smem:[#allocation3 + %s487_s15]] (!%p164_p0)  ;;  %s991_s27 = smov (!%p164_p0), 1  }
  0x20   : > { %s493_s7 = sadd.s32 (!%p164_p0), 4, %s1161_s13  ;;  %s495_s8 = sadd.s32 (!%p164_p0), 5, %s1161_s13 }
  0x21   : > { %s494_s10 = sld [smem:[#allocation3 + %s493_s7]] (!%p164_p0)  ;;  %s677_s15 = sshll.u32 (!%p164_p0), %s1042_s23, 4 }
  0x22   : > { %s496_s11 = sld [smem:[#allocation3 + %s495_s8]] (!%p164_p0)  ;;  %s1181_s19 = scalar_lea.hbm (!%p164_p0), %s1227_s4, %s677_s15 }
  0x24   : > { %s1073_s5 = scalar_select %p192_p1, %s1042_s23, 1 }
  0x25   : > { %s517_s17 = ssub.f32 1.0, %s488_s16  ;;  %s992_s23 = smov [#allocation4]  }
  0x26   : > { %s680_s6 = sshll.u32 %s1073_s5, 7  ;;  %s194_s12 = scalar_lea.vmem %s1224_s1, %s1073_s5 }
  0x27   : > { %s1079_s9 = scalar_lea.vmem %s1226_s3, %s680_s6  ;;  %v219_v11 = vld [vmem:[%s194_s12] sm:$0x1]  ;;  %s197_s24 = scalar_lea.vmem %s1225_s2, %s1073_s5 }
  0x28   : > { %v203_v2 = vld [vmem:[%s1079_s9] sm:$0xff]  ;;  %v204_v3 = vld [vmem:[%s1079_s9 + $0x8] sm:$0xff]  ;;  %v205_v8 = vld [vmem:[%s1079_s9 + $0x10] sm:$0xff]  ;;  %v1101_v14 = vadd.f32 1e-12, %v219_v11  ;;  %v519_v11 = vstv %s517_s17  ;;  %s491_s6 = sadd.s32 3, %s1161_s13 }
  0x29   : > { %v343_v4 = vmul.f32 %v203_v2, %v203_v2  ;;  %v344_v5 = vmul.f32 %v204_v3, %v204_v3  ;;  %v786_v6 = vpack.c.bf16 %v204_v3, %v203_v2  ;;  %v206_v9 = vld [vmem:[%s1079_s9 + $0x18] sm:$0xff]  ;;  %v345_v12 = vmul.f32 %v205_v8, %v205_v8  ;;  %v207_v18 = vld [vmem:[%s1079_s9 + $0x20] sm:$0xff]  ;;  %v208_v19 = vld [vmem:[%s1079_s9 + $0x28] sm:$0xff]  ;;  %s489_s5 = sadd.s32 2, %s1161_s13 }
  0x2a   : > { %v346_v13 = vmul.f32 %v206_v9, %v206_v9  ;;  %v790_v15 = vpack.c.bf16 %v206_v9, %v205_v8  ;;  %v480_v16 = vmul.f32 %v1101_v14, %v1101_v14  ;;  %v347_v21 = vmul.f32 %v207_v18, %v207_v18  ;;  %v209_v25 = vld [vmem:[%s1079_s9 + $0x30] sm:$0xff]  ;;  %v210_v26 = vld [vmem:[%s1079_s9 + $0x38] sm:$0xff]  ;;  %v211_v31 = vld [vmem:[%s1079_s9 + $0x40] sm:$0xff]  ;;  %s490_s12 = sld [smem:[#allocation3 + %s489_s5]] }
  0x2b   : > { %v818_v10 = vpack.c.bf16 %v344_v5, %v343_v4  ;;  %788 = vmatpush3.bf16.xpose.msk.msra.mxu0 %vm1089_vm2, %v786_v6  ;;  %v348_v22 = vmul.f32 %v208_v19, %v208_v19  ;;  %v794_v23 = vpack.c.bf16 %v208_v19, %v207_v18  ;;  %v349_v27 = vmul.f32 %v209_v25, %v209_v25  ;;  %v212_v32 = vld [vmem:[%s1079_s9 + $0x48] sm:$0xff]  ;;  %v213_v37 = vld [vmem:[%s1079_s9 + $0x50] sm:$0xff]  ;;  %v214_v38 = vld [vmem:[%s1079_s9 + $0x58] sm:$0xff] }
  0x2c   : > { %789 = vmatprep.subr.bf16.mxu0 %v986_v0  ;;  %v822_v17 = vpack.c.bf16 %v346_v13, %v345_v12  ;;  %v482_v20 = vsel %vm481_vm3, %v480_v16, 0.0  ;;  %v350_v28 = vmul.f32 %v210_v26, %v210_v26  ;;  %v798_v29 = vpack.c.bf16 %v210_v26, %v209_v25  ;;  %v215_v43 = vld [vmem:[%s1079_s9 + $0x60] sm:$0xff]  ;;  %v216_v44 = vld [vmem:[%s1079_s9 + $0x68] sm:$0xff]  ;;  %v217_v49 = vld [vmem:[%s1079_s9 + $0x70] sm:$0xff] }
  0x2d   : > { %820 = vmatpush3.bf16.xpose.msk.msra.mxu1 %vm1089_vm2, %v818_v10  ;;  %483 = vadd.xlane.f32.xlu0 %v482_v20  ;;  %v826_v24 = vpack.c.bf16 %v348_v22, %v347_v21  ;;  %v351_v33 = vmul.f32 %v211_v31, %v211_v31  ;;  %v352_v34 = vmul.f32 %v212_v32, %v212_v32  ;;  %v218_v50 = vld [vmem:[%s1079_s9 + $0x78] sm:$0xff]  ;;  %v518_v10 = vld [vmem:[%s197_s24] sm:$0x1]  ;;  %v515_v13 = vstv %s488_s16  ;;  %s492_s9 = sld [smem:[#allocation3 + %s491_s6]] }
  0x2e   : > { %821 = vmatprep.subr.bf16.mxu1 %v986_v0  ;;  %v830_v30 = vpack.c.bf16 %v350_v28, %v349_v27  ;;  %v802_v35 = vpack.c.bf16 %v212_v32, %v211_v31  ;;  %v353_v39 = vmul.f32 %v213_v37, %v213_v37  ;;  %v354_v40 = vmul.f32 %v214_v38, %v214_v38 }
  0x2f   : > { %v834_v36 = vpack.c.bf16 %v352_v34, %v351_v33  ;;  %v806_v41 = vpack.c.bf16 %v214_v38, %v213_v37  ;;  %v355_v45 = vmul.f32 %v215_v43, %v215_v43  ;;  %v356_v46 = vmul.f32 %v216_v44, %v216_v44 }
  0x30   : > { %v838_v42 = vpack.c.bf16 %v354_v40, %v353_v39  ;;  %v810_v47 = vpack.c.bf16 %v216_v44, %v215_v43  ;;  %v357_v51 = vmul.f32 %v217_v49, %v217_v49  ;;  %v358_v52 = vmul.f32 %v218_v50, %v218_v50 }
  0x31   : > { %v842_v48 = vpack.c.bf16 %v356_v46, %v355_v45  ;;  %v814_v53 = vpack.c.bf16 %v218_v50, %v217_v49  ;;  %v528_v19 = vstv %s494_s10  ;;  %v534_v20 = vstv %s496_s11 }
  0x32   : > { %v846_v54 = vpack.c.bf16 %v358_v52, %v357_v51 }
  0x33   : > { %792 = vmatpush3.bf16.xpose.msk.msra.mxu0 %vm1089_vm2, %v790_v15  ;;  %v520_v15 = vmul.f32 %v519_v11, %v518_v10  ;;  %v526_v18 = vstv %s492_s9 }
  0x34   : > { %793 = vmatprep.subr.bf16.mxu0 %v986_v0 }
  0x35   : > { %824 = vmatpush3.bf16.xpose.msk.msra.mxu1 %vm1089_vm2, %v822_v17 }
  0x36   : > { %825 = vmatprep.subr.bf16.mxu1 %v986_v0 }
  0x3b   : > { %796 = vmatpush3.bf16.xpose.msk.msra.mxu0 %vm1089_vm2, %v794_v23 }
  0x3c   : > { %797 = vmatprep.subr.bf16.mxu0 %v986_v0 }
  0x3d   : > { %828 = vmatpush3.bf16.xpose.msk.msra.mxu1 %vm1089_vm2, %v826_v24 }
  0x3e   : > { %829 = vmatprep.subr.bf16.mxu1 %v986_v0 }
  0x43   : > { %800 = vmatpush3.bf16.xpose.msk.msra.mxu0 %vm1089_vm2, %v798_v29 }
  0x44   : > { %801 = vmatprep.subr.bf16.mxu0 %v986_v0 }
  0x45   : > { %832 = vmatpush3.bf16.xpose.msk.msra.mxu1 %vm1089_vm2, %v830_v30  ;;  %v540_v30 = vstv %s490_s12 }
  0x46   : > { %833 = vmatprep.subr.bf16.mxu1 %v986_v0 }
  0x4b   : > { %804 = vmatpush3.bf16.xpose.msk.msra.mxu0 %vm1089_vm2, %v802_v35 }
  0x4c   : > { %805 = vmatprep.subr.bf16.mxu0 %v986_v0 }
  0x4d   : > { %836 = vmatpush3.bf16.xpose.msk.msra.mxu1 %vm1089_vm2, %v834_v36 }
  0x4e   : > { %837 = vmatprep.subr.bf16.mxu1 %v986_v0 }
  0x53   : > { %808 = vmatpush3.bf16.xpose.msk.msra.mxu0 %vm1089_vm2, %v806_v41 }
  0x54   : > { %809 = vmatprep.subr.bf16.mxu0 %v986_v0 }
  0x55   : > { %840 = vmatpush3.bf16.xpose.msk.msra.mxu1 %vm1089_vm2, %v838_v42 }
  0x56   : > { %841 = vmatprep.subr.bf16.mxu1 %v986_v0 }
  0x5b   : > { %812 = vmatpush3.bf16.xpose.msk.msra.mxu0 %vm1089_vm2, %v810_v47 }
  0x5c   : > { %813 = vmatprep.subr.bf16.mxu0 %v986_v0 }
  0x5d   : > { %844 = vmatpush3.bf16.xpose.msk.msra.mxu1 %vm1089_vm2, %v842_v48 }
  0x5e   : > { %845 = vmatprep.subr.bf16.mxu1 %v986_v0  ;;  %v501_v0 = vstv %s486_s14  ;;  %s190_s14 = sand.u32 1, %s975_s21  }
  0x5f   : > { %s191_s13 = scalar_lea.vmem [#allocation4], %s190_s14  ;;  %s552_s24 = scalar_lea.sflag [#allocation5], %s190_s14 }
  0x60   : > { %s564_s16 = sshll.u32 %s191_s13, 4  ;;  %s1183_s16 = int_to_ptr.vmem [resolvable:$true] %s564_s16 }
  0x63   : > { %816 = vmatpush3.bf16.xpose.msk.msra.mxu0 %vm1089_vm2, %v814_v53 }
  0x65   : > { %848 = vmatpush3.bf16.xpose.msk.msra.mxu1 %vm1089_vm2, %v846_v54 }
  0x6a   : > { %748 = vmatmul.mubr.msk.f32.vlgmr.msra.gmra.mrb[0].mxu0 %vm221_vm1, %v1101_v14 }
  0x6c   : > { %783 = vmatmul.mubr.msk.f32.vlgmr.msra.gmra.mrb[0].mxu1 %vm221_vm1, %v989_v55 }
  0xba   : > { %v484_v56 = vpop.xlane.xlu0 %483 }
 0x13d   : > { %v339_v57 = vpop.f32.mrb[0].mxu0 }
 0x13e   : > { %v749_v58 = vpop.f32.mrb[1].mxu0 }
 0x13f   : > { %v476_v59 = vpop.f32.mrb[0].mxu1 }
 0x140   : > { %v497_v60 = vmul.f32 %v484_v56, %v476_v59  ;;  %v784_v61 = vpop.f32.mrb[1].mxu1 }
 0x142   : > { %v498_v62 = vmax.f32 %v497_v60, 1e-16 }
 0x144   : > { %895 = vrsqrt.f32 %v498_v62 }
 0x14e   : > { %v896_v63 = vpop.eup %895 }
 0x14f   : > { %v500_v1 = vmul.f32 %v896_v63, %v339_v57 }
 0x151   : > { %v502_v2 = vmul.f32 %v501_v0, %v500_v1 }
 0x153   : > { %v504_v3 = vsel %vm503_vm4, %v502_v2, -inf }
 0x154   : > { %505 = vmax.xlane.f32.xlu0 %v504_v3 }
 0x1e1   : > { %v506_v4 = vpop.xlane.xlu0 %505 }
 0x1e2   : > { %v507_v5 = vsub.f32 %v502_v2, %v506_v4 }
 0x1e4   : > { %v508_v6 = vmul.f32 1.442695, %v507_v5 }
 0x1e6   : > { %897 = vpow2.f32 %v508_v6 }
 0x1f0   : > { %v898_v7 = vpop.eup %897 }
 0x1f1   : > { %v510_v8 = vsel %vm503_vm4, %v898_v7, 0.0 }
 0x1f2   : > { %511 = vadd.xlane.f32.xlu1 %v510_v8 }
 0x27f   : > { %v512_v9 = vpop.xlane.xlu1 %511 }
 0x280   : > { %899 = vrcp.f32 %v512_v9 }
 0x28a   : > { %v900_v12 = vpop.eup %899 }
 0x28b   : > { %v514_v14 = vmul.f32 %v900_v12, %v898_v7 }
 0x28d   : > { %v516_v16 = vmul.f32 %v515_v13, %v514_v14 }
 0x28f   : > { %v521_v17 = vadd.f32 %v520_v15, %v516_v16 }
 0x291   : > { %531 = vrot.lane.b32.xlu0 %v521_v17, %s990_s26  ;;  %523 = vrot.lane.b32.xlu1 %v521_v17, %s991_s27  ;;  %v529_v24 = vmul.f32 %v528_v19, %v521_v17  ;;  %s919_s26 = scalar_lea.vmem %s1183_s16, 16  ;;  %s923_s27 = sshll.u32 %s992_s23, 4  ;;  %s924_s27 = int_to_ptr.vmem [resolvable:$false] %s923_s27 }
 0x292   : > { %p920_p2 = scmp.ne.s32.totalorder %s1183_s16, %s919_s26  ;;  %s925_s6 = scalar_lea.vmem %s924_s27, 32 }
 0x293   : > { %p926_p5 = scmp.lt.s32.totalorder %s1183_s16, %s924_s27  ;;  %p927_p6 = scmp.lt.s32.totalorder %s925_s6, %s919_s26 }
 0x294   : > { %p921_p3 = pnand %p920_p2, %p1059_p10 }
 0x295   : > { %p928_p7 = por %p927_p6, %p926_p5 }
 0x296   : > { %p922_p4 = pneg %p921_p3 }
 0x298   : > { %p929_p8 = pnand %p928_p7, %p922_p4 }
 0x303   : > { %v532_v21 = vpop.permute.xlu0 %531  ;;  %v524_v22 = vpop.permute.xlu1 %523 }
 0x304   : > { %v527_v23 = vmul.f32 %v526_v18, %v524_v22  ;;  %v535_v25 = vmul.f32 %v534_v20, %v532_v21 }
 0x306   : > { %v530_v26 = vadd.f32 %v529_v24, %v527_v23 }
 0x308   : > { %v536_v27 = vadd.f32 %v535_v25, %v530_v26 }
 0x30a   : > { %v537_v28 = vmax.f32 %v536_v27, 1e-30 }
 0x30c   : > { %901 = vlog2.f32 %v537_v28 }
 0x316   : > { %v902_v29 = vpop.eup %901 }
 0x317   : > { %v539_v31 = vmul.f32 0.6931472, %v902_v29 }
 0x319   : > { %v541_v32 = vmul.f32 %v540_v30, %v539_v31 }
 0x31b   : > { %v542_v33 = vmul.f32 1.442695, %v541_v32 }
 0x31d   : > { %903 = vpow2.f32 %v542_v33 }
 0x327   : > { %v904_v34 = vpop.eup %903 }
 0x328   : > { %v544_v35 = vsel %vm503_vm4, %v904_v34, 0.0 }
 0x329   : > { %545 = vadd.xlane.f32.xlu1 %v544_v35 }
 0x3b6   : > { %v546_v36 = vpop.xlane.xlu1 %545 }
 0x3b7   : > { %v547_v37 = vadd.f32 1e-12, %v546_v36 }
 0x3b9   : > { %905 = vrcp.f32 %v547_v37 }
 0x3c3   : > { %v906_v38 = vpop.eup %905 }
 0x3c4   : > { %v549_v39 = vmul.f32 %v906_v38, %v904_v34 }
 0x3c6   : > { %550 = vst [vmem:[%s191_s13] sm:$0x1] %v549_v39 }
 0x3c7   : > { %932 = shalt.err (!%p929_p8)
}
 0x3c8   : > { %s933_s7 = scalar_lea.hbm %s1181_s19, 16  ;;  %s937_s10 = scalar_lea.hbm %s1227_s4, 32 }
 0x3c9   : > { %p934_p9 = scmp.ne.s32.totalorder %s1181_s19, %s933_s7  ;;  %p938_p0 = scmp.lt.u32.totalorder %s1181_s19, %s1227_s4 }
 0x3ca   : > { %p939_p1 = scmp.lt.u32.totalorder %s937_s10, %s933_s7  ;;  %p941_p3 = scmp.lt.u32.totalorder %s933_s7, %s1181_s19 }
 0x3cb   : > { %p935_p12 = pnand %p934_p9, %p1059_p10 }
 0x3cc   : > { %p940_p2 = por %p939_p1, %p938_p0 }
 0x3cd   : > { %p936_p13 = pneg %p935_p12 }
 0x3ce   : > { %p942_p4 = por %p941_p3, %p940_p2 }
 0x3d0   : > { %p943_p5 = pnand %p942_p4, %p936_p13 }
 0x3d2   : > { %946 = shalt.err (!%p943_p5)
}
 0x3d3   : > { %849 = dma.vmem_to_hbm [thread:$0]  (%p1059_p10), %s1183_s16, 16, %s1181_s19, %s552_s24  }
 0x3d4 PF: > { %p855_p6 = scmp.ge.s32.totalorder %s983_s22, 2  ;;  %s576_s12 = sand.u32 1, %s971_s20  }
 0x3d5   : > { %s577_s14 = scalar_lea.sflag [#allocation5], %s576_s12 }
 0x3d6   : > { %p852_p7 = pnand %p855_p6, %p1063_p11 }
 0x3d8   : > { %966 = dma.done.wait (!%p852_p7), %s577_s14, 16  }
 0x3d9   : > { %968 = vsyncadd (!%p852_p7), %s577_s14, 4294967280  ;;  %p20_p8 = scmp.ge.s32.totalorder %s1046_s25, 4   ;;  %s1232_s20 = smov %s975_s21 }
 0x3da   : > { %s1233_s21 = smov %s979_s0  ;;  %s1234_s0 = smov %s1057_s28 }
 0x3db   : > { %s1235_s22 = smov %s1046_s25  ;;  %22 = sbr.rel (!%p20_p8) target bundleno = 18 (0x12), region = 73 }
 0x3e2   :  { %581 = vsyncpa [#allocation5], 1 }
 0x3e3   :  { %583 = vsyncpa [#allocation5 + $0x1], 1 }

</bundles_post_ra>
